<compile_context>
chip_gen: v6e
topology: v6e:2x2x1
jax: 0.10.0
libtpu: 0.0.40
codegen_flags: <defaults>
</compile_context>

<pallas_src>
import functools

import numpy as np
import jax
import jax.numpy as jnp
from jax.experimental import pallas as pl
from jax.experimental.pallas import tpu as pltpu


def _conv2d_same_kernel(x_ref, w_ref, b_ref, mask_ref, o_ref, patches_ref,
                        *, H, W, KH, KW, pad, cin):
    """Stride-1 'same' conv for one batch element, spatial dims flattened.

    x_ref:       (1, Cin, H*W)       input image (NCHW with H*W flattened)
    w_ref:       (Cout, KH*KW*Cin)   weights, row order (dy, dx, ci)
    b_ref:       (Cout, 1)           bias
    mask_ref:    (KH*KW, H*W)        per-tap {0,1} boundary masks
    o_ref:       (1, Cout, H*W)      output
    patches_ref: (KH*KW*Cin, H*W)    VMEM im2col scratch
    """
    hw = H * W
    x = x_ref[0]                                           # (Cin, H*W), f32

    # Build the im2col matrix: one roll (+mask) per kernel tap, all channels
    # at once.  Rolls run on the XLU, mask-multiplies on the VPU; both are
    # cheap and leave the MXU / store path free.
    for dy in range(KH):
        for dx in range(KW):
            tap = dy * KW + dx
            shift = (dy - pad) * W + (dx - pad)            # flat source offset
            if shift == 0:
                shifted = x                                # center tap: no-op
            else:
                # shifted[p] = x[p + shift]   (np.roll convention)
                shifted = pltpu.roll(x, (-shift) % hw, axis=1)
                # zero out positions whose source lies in the zero padding
                shifted = shifted * mask_ref[tap:tap + 1, :]
            patches_ref[tap * cin:(tap + 1) * cin, :] = shifted

    # Single MXU matmul with a lane-dense (Cout, H*W) result.
    out = jax.lax.dot_general(
        w_ref[...], patches_ref[...],
        dimension_numbers=(((1,), (0,)), ((), ())),
        preferred_element_type=jnp.float32,
    )
    o_ref[0] = (out + b_ref[...]).astype(o_ref.dtype)


def my_convo2d(x_nchw, weight_oihw, bias, kernel_size):
    """Forward pass of MyConvo2d: Conv2d(stride=1, padding=(k-1)//2, bias=True)."""
    if kernel_size % 2 != 1:
        # pad=(k-1)//2 only reproduces 'same' output for odd kernel sizes.
        raise ValueError("MyConvo2d requires an odd kernel_size")

    N, Cin, H, W = x_nchw.shape
    Cout = weight_oihw.shape[0]
    KH = KW = kernel_size
    pad = (kernel_size - 1) // 2
    HW = H * W
    K = KH * KW * Cin

    # --- glue (all cheap / trace-time constant; no activation transposes) ---
    x_flat = x_nchw.reshape(N, Cin, HW)                    # free row-major reshape
    # (Cout, Cin, KH, KW) -> (Cout, KH*KW*Cin), row order (dy, dx, ci) to match
    # the im2col rows built in the kernel.  Weights are tiny (~KB).
    w_mat = jnp.transpose(weight_oihw, (0, 2, 3, 1)).reshape(Cout, K)
    b_col = bias.reshape(Cout, 1)

    # Per-tap boundary masks (compile-time numpy constant, ~KH*KW*HW*4 bytes).
    ys, xs = np.meshgrid(np.arange(H), np.arange(W), indexing="ij")
    ys = ys.reshape(-1)
    xs = xs.reshape(-1)
    masks_np = np.zeros((KH * KW, HW), dtype=np.float32)
    for dy in range(KH):
        for dx in range(KW):
            valid = ((ys + dy - pad >= 0) & (ys + dy - pad < H) &
                     (xs + dx - pad >= 0) & (xs + dx - pad < W))
            masks_np[dy * KW + dx] = valid.astype(np.float32)
    masks = jnp.asarray(masks_np)

    kernel = functools.partial(_conv2d_same_kernel,
                               H=H, W=W, KH=KH, KW=KW, pad=pad, cin=Cin)

    out_flat = pl.pallas_call(
        kernel,
        out_shape=jax.ShapeDtypeStruct((N, Cout, HW), x_nchw.dtype),
        grid_spec=pltpu.PrefetchScalarGridSpec(
            num_scalar_prefetch=0,
            grid=(N,),                                      # parallel over batch
            in_specs=[
                pl.BlockSpec((1, Cin, HW), lambda n: (n, 0, 0)),
                pl.BlockSpec((Cout, K), lambda n: (0, 0)),  # resident across steps
                pl.BlockSpec((Cout, 1), lambda n: (0, 0)),
                pl.BlockSpec((KH * KW, HW), lambda n: (0, 0)),
            ],
            out_specs=pl.BlockSpec((1, Cout, HW), lambda n: (n, 0, 0)),
            scratch_shapes=[pltpu.VMEM((K, HW), jnp.float32)],
        ),
        compiler_params=pltpu.CompilerParams(
            dimension_semantics=("parallel",),              # megacore-friendly
        ),
    )(x_flat, w_mat, b_col, masks)

    return out_flat.reshape(N, Cout, H, W)                  # free reshape -> NCHW


if __name__ == "__main__":
    # MyConvo2d(input_dim=4, output_dim=8, kernel_size=3, stride=1, bias=True)
    input_dim, output_dim, kernel_size = 4, 8, 3
    N, H, W = 2, 16, 16

    key = jax.random.PRNGKey(0)
    kx, kw, kb = jax.random.split(key, 3)

    x = jax.random.normal(kx, (N, input_dim, H, W), dtype=jnp.float32)
    fan_in = input_dim * kernel_size * kernel_size
    bound = 1.0 / float(fan_in) ** 0.5
    weight = jax.random.uniform(
        kw, (output_dim, input_dim, kernel_size, kernel_size),
        minval=-bound, maxval=bound, dtype=jnp.float32)
    bias = jax.random.uniform(
        kb, (output_dim,), minval=-bound, maxval=bound, dtype=jnp.float32)

    out = jax.block_until_ready(my_convo2d(x, weight, bias, kernel_size))

    # Cross-check against the XLA reference convolution (same semantics as
    # nn.Conv2d(stride=1, padding=(k-1)//2, bias=True)).
    pad = (kernel_size - 1) // 2
    ref = jax.lax.conv_general_dilated(
        x, weight, window_strides=(1, 1),
        padding=[(pad, pad), (pad, pad)],
        dimension_numbers=("NCHW", "OIHW", "NCHW"),
    ) + bias[None, :, None, None]

    assert out.shape == (N, output_dim, H, W)
    err = float(jnp.max(jnp.abs(out - ref)))
    assert jnp.allclose(out, ref, atol=1e-4, rtol=1e-4), f"max abs err = {err}"

    print("KERNEL_OK")
</pallas_src>

<mosaic_0001>
module attributes {stable_mosaic.version = 11 : i64} {
  func.func @_conv2d_same_kernel(%arg0: i32, %arg1: memref<1x4x256xf32, #tpu.memory_space<vmem>>, %arg2: memref<8x36xf32, #tpu.memory_space<vmem>>, %arg3: memref<8x1xf32, #tpu.memory_space<vmem>>, %arg4: memref<9x256xf32, #tpu.memory_space<vmem>>, %arg5: memref<1x8x256xf32, #tpu.memory_space<vmem>>, %arg6: memref<36x256xf32, #tpu.memory_space<vmem>>) attributes {dimension_semantics = [#tpu.dimension_semantics<parallel>], iteration_bounds = array<i64: 2>, scalar_prefetch = 0 : i64, scratch_operands = 1 : i64, tpu.core_type = #tpu.core_type<tc>, window_params = [{transform_indices = @transform_0, window_bounds = array<i64: 1, 4, 256>}, {pipeline_mode = #tpu.pipeline_mode<synchronous>, transform_indices = @transform_1, window_bounds = array<i64: 8, 36>}, {pipeline_mode = #tpu.pipeline_mode<synchronous>, transform_indices = @transform_2, window_bounds = array<i64: 8, 1>}, {pipeline_mode = #tpu.pipeline_mode<synchronous>, transform_indices = @transform_3, window_bounds = array<i64: 9, 256>}, {transform_indices = @transform_4, window_bounds = array<i64: 1, 8, 256>}]} {
    %c0 = arith.constant 0 : index
    %c0_0 = arith.constant 0 : index
    %c0_1 = arith.constant 0 : index
    %0 = vector.load %arg1[%c0, %c0_0, %c0_1] : memref<1x4x256xf32, #tpu.memory_space<vmem>>, vector<1x4x256xf32>
    %1 = vector.shape_cast %0 : vector<1x4x256xf32> to vector<4x256xf32>
    %c17_i32 = arith.constant 17 : i32
    %2 = tpu.dynamic_rotate %1 by %c17_i32 dim 1 : vector<4x256xf32>, i32 -> vector<4x256xf32>
    %c0_2 = arith.constant 0 : index
    %c0_3 = arith.constant 0 : index
    %3 = vector.load %arg4[%c0_2, %c0_3] : memref<9x256xf32, #tpu.memory_space<vmem>>, vector<1x256xf32>
    %4 = vector.broadcast %3 : vector<1x256xf32> to vector<4x256xf32>
    %5 = arith.mulf %2, %4 : vector<4x256xf32>
    %c0_4 = arith.constant 0 : index
    %c0_5 = arith.constant 0 : index
    %6 = vector.load %arg6[%c0_4, %c0_5] : memref<36x256xf32, #tpu.memory_space<vmem>>, vector<4x256xf32>
    tpu.vector_store %arg6[%c0_4, %c0_5], %5 {strides = array<i32>} : memref<36x256xf32, #tpu.memory_space<vmem>>, vector<4x256xf32>,
    %c16_i32 = arith.constant 16 : i32
    %7 = tpu.dynamic_rotate %1 by %c16_i32 dim 1 : vector<4x256xf32>, i32 -> vector<4x256xf32>
    %c1 = arith.constant 1 : index
    %c0_6 = arith.constant 0 : index
    %8 = vector.load %arg4[%c1, %c0_6] : memref<9x256xf32, #tpu.memory_space<vmem>>, vector<1x256xf32>
    %9 = vector.broadcast %8 : vector<1x256xf32> to vector<4x256xf32>
    %10 = arith.mulf %7, %9 : vector<4x256xf32>
    %c4 = arith.constant 4 : index
    %c0_7 = arith.constant 0 : index
    %11 = vector.load %arg6[%c4, %c0_7] : memref<36x256xf32, #tpu.memory_space<vmem>>, vector<4x256xf32>
    tpu.vector_store %arg6[%c4, %c0_7], %10 {strides = array<i32>} : memref<36x256xf32, #tpu.memory_space<vmem>>, vector<4x256xf32>,
    %c15_i32 = arith.constant 15 : i32
    %12 = tpu.dynamic_rotate %1 by %c15_i32 dim 1 : vector<4x256xf32>, i32 -> vector<4x256xf32>
    %c2 = arith.constant 2 : index
    %c0_8 = arith.constant 0 : index
    %13 = vector.load %arg4[%c2, %c0_8] : memref<9x256xf32, #tpu.memory_space<vmem>>, vector<1x256xf32>
    %14 = vector.broadcast %13 : vector<1x256xf32> to vector<4x256xf32>
    %15 = arith.mulf %12, %14 : vector<4x256xf32>
    %c8 = arith.constant 8 : index
    %c0_9 = arith.constant 0 : index
    %16 = vector.load %arg6[%c8, %c0_9] : memref<36x256xf32, #tpu.memory_space<vmem>>, vector<4x256xf32>
    tpu.vector_store %arg6[%c8, %c0_9], %15 {strides = array<i32>} : memref<36x256xf32, #tpu.memory_space<vmem>>, vector<4x256xf32>,
    %c1_i32 = arith.constant 1 : i32
    %17 = tpu.dynamic_rotate %1 by %c1_i32 dim 1 : vector<4x256xf32>, i32 -> vector<4x256xf32>
    %c3 = arith.constant 3 : index
    %c0_10 = arith.constant 0 : index
    %18 = vector.load %arg4[%c3, %c0_10] : memref<9x256xf32, #tpu.memory_space<vmem>>, vector<1x256xf32>
    %19 = vector.broadcast %18 : vector<1x256xf32> to vector<4x256xf32>
    %20 = arith.mulf %17, %19 : vector<4x256xf32>
    %c12 = arith.constant 12 : index
    %c0_11 = arith.constant 0 : index
    %21 = vector.load %arg6[%c12, %c0_11] : memref<36x256xf32, #tpu.memory_space<vmem>>, vector<4x256xf32>
    tpu.vector_store %arg6[%c12, %c0_11], %20 {strides = array<i32>} : memref<36x256xf32, #tpu.memory_space<vmem>>, vector<4x256xf32>,
    %c16 = arith.constant 16 : index
    %c0_12 = arith.constant 0 : index
    %22 = vector.load %arg6[%c16, %c0_12] : memref<36x256xf32, #tpu.memory_space<vmem>>, vector<4x256xf32>
    tpu.vector_store %arg6[%c16, %c0_12], %1 {strides = array<i32>} : memref<36x256xf32, #tpu.memory_space<vmem>>, vector<4x256xf32>,
    %c255_i32 = arith.constant 255 : i32
    %23 = tpu.dynamic_rotate %1 by %c255_i32 dim 1 : vector<4x256xf32>, i32 -> vector<4x256xf32>
    %c5 = arith.constant 5 : index
    %c0_13 = arith.constant 0 : index
    %24 = vector.load %arg4[%c5, %c0_13] : memref<9x256xf32, #tpu.memory_space<vmem>>, vector<1x256xf32>
    %25 = vector.broadcast %24 : vector<1x256xf32> to vector<4x256xf32>
    %26 = arith.mulf %23, %25 : vector<4x256xf32>
    %c20 = arith.constant 20 : index
    %c0_14 = arith.constant 0 : index
    %27 = vector.load %arg6[%c20, %c0_14] : memref<36x256xf32, #tpu.memory_space<vmem>>, vector<4x256xf32>
    tpu.vector_store %arg6[%c20, %c0_14], %26 {strides = array<i32>} : memref<36x256xf32, #tpu.memory_space<vmem>>, vector<4x256xf32>,
    %c241_i32 = arith.constant 241 : i32
    %28 = tpu.dynamic_rotate %1 by %c241_i32 dim 1 : vector<4x256xf32>, i32 -> vector<4x256xf32>
    %c6 = arith.constant 6 : index
    %c0_15 = arith.constant 0 : index
    %29 = vector.load %arg4[%c6, %c0_15] : memref<9x256xf32, #tpu.memory_space<vmem>>, vector<1x256xf32>
    %30 = vector.broadcast %29 : vector<1x256xf32> to vector<4x256xf32>
    %31 = arith.mulf %28, %30 : vector<4x256xf32>
    %c24 = arith.constant 24 : index
    %c0_16 = arith.constant 0 : index
    %32 = vector.load %arg6[%c24, %c0_16] : memref<36x256xf32, #tpu.memory_space<vmem>>, vector<4x256xf32>
    tpu.vector_store %arg6[%c24, %c0_16], %31 {strides = array<i32>} : memref<36x256xf32, #tpu.memory_space<vmem>>, vector<4x256xf32>,
    %c240_i32 = arith.constant 240 : i32
    %33 = tpu.dynamic_rotate %1 by %c240_i32 dim 1 : vector<4x256xf32>, i32 -> vector<4x256xf32>
    %c7 = arith.constant 7 : index
    %c0_17 = arith.constant 0 : index
    %34 = vector.load %arg4[%c7, %c0_17] : memref<9x256xf32, #tpu.memory_space<vmem>>, vector<1x256xf32>
    %35 = vector.broadcast %34 : vector<1x256xf32> to vector<4x256xf32>
    %36 = arith.mulf %33, %35 : vector<4x256xf32>
    %c28 = arith.constant 28 : index
    %c0_18 = arith.constant 0 : index
    %37 = vector.load %arg6[%c28, %c0_18] : memref<36x256xf32, #tpu.memory_space<vmem>>, vector<4x256xf32>
    tpu.vector_store %arg6[%c28, %c0_18], %36 {strides = array<i32>} : memref<36x256xf32, #tpu.memory_space<vmem>>, vector<4x256xf32>,
    %c239_i32 = arith.constant 239 : i32
    %38 = tpu.dynamic_rotate %1 by %c239_i32 dim 1 : vector<4x256xf32>, i32 -> vector<4x256xf32>
    %c8_19 = arith.constant 8 : index
    %c0_20 = arith.constant 0 : index
    %39 = vector.load %arg4[%c8_19, %c0_20] : memref<9x256xf32, #tpu.memory_space<vmem>>, vector<1x256xf32>
    %40 = vector.broadcast %39 : vector<1x256xf32> to vector<4x256xf32>
    %41 = arith.mulf %38, %40 : vector<4x256xf32>
    %c32 = arith.constant 32 : index
    %c0_21 = arith.constant 0 : index
    %42 = vector.load %arg6[%c32, %c0_21] : memref<36x256xf32, #tpu.memory_space<vmem>>, vector<4x256xf32>
    tpu.vector_store %arg6[%c32, %c0_21], %41 {strides = array<i32>} : memref<36x256xf32, #tpu.memory_space<vmem>>, vector<4x256xf32>,
    %c0_22 = arith.constant 0 : index
    %c0_23 = arith.constant 0 : index
    %43 = vector.load %arg2[%c0_22, %c0_23] : memref<8x36xf32, #tpu.memory_space<vmem>>, vector<8x36xf32>
    %c0_24 = arith.constant 0 : index
    %c0_25 = arith.constant 0 : index
    %44 = vector.load %arg6[%c0_24, %c0_25] : memref<36x256xf32, #tpu.memory_space<vmem>>, vector<36x256xf32>
    %cst = arith.constant dense<0.000000e+00> : vector<8x256xf32>
    %45 = tpu.matmul %43, %44, %cst {dimension_numbers = #tpu.dot_dimension_numbers<[1], [0], [0], [1], [0, 0, 1, 1], [], []>} : vector<8x36xf32>, vector<36x256xf32>, vector<8x256xf32> -> vector<8x256xf32>
    %c0_26 = arith.constant 0 : index
    %c0_27 = arith.constant 0 : index
    %46 = vector.load %arg3[%c0_26, %c0_27] : memref<8x1xf32, #tpu.memory_space<vmem>>, vector<8x1xf32>
    %47 = vector.broadcast %46 : vector<8x1xf32> to vector<8x256xf32>
    %48 = arith.addf %45, %47 : vector<8x256xf32>
    %c0_28 = arith.constant 0 : index
    %c0_29 = arith.constant 0 : index
    %c0_30 = arith.constant 0 : index
    %49 = vector.load %arg5[%c0_28, %c0_29, %c0_30] : memref<1x8x256xf32, #tpu.memory_space<vmem>>, vector<1x8x256xf32>
    %50 = vector.shape_cast %49 : vector<1x8x256xf32> to vector<8x256xf32>
    %51 = vector.shape_cast %48 : vector<8x256xf32> to vector<1x8x256xf32>
    tpu.vector_store %arg5[%c0_28, %c0_29, %c0_30], %51 {strides = array<i32>} : memref<1x8x256xf32, #tpu.memory_space<vmem>>, vector<1x8x256xf32>,
    return
  }
  func.func @transform_0(%arg0: i32) -> (i32, i32, i32) {
    %c0_i32 = arith.constant 0 : i32
    %c0_i32_0 = arith.constant 0 : i32
    %c0_i32_1 = arith.constant 0 : i32
    return %arg0, %c0_i32, %c0_i32_0 : i32, i32, i32
  }
  func.func @transform_1(%arg0: i32) -> (i32, i32) {
    %c0_i32 = arith.constant 0 : i32
    %c0_i32_0 = arith.constant 0 : i32
    %c0_i32_1 = arith.constant 0 : i32
    return %c0_i32, %c0_i32_0 : i32, i32
  }
  func.func @transform_2(%arg0: i32) -> (i32, i32) {
    %c0_i32 = arith.constant 0 : i32
    %c0_i32_0 = arith.constant 0 : i32
    %c0_i32_1 = arith.constant 0 : i32
    return %c0_i32, %c0_i32_0 : i32, i32
  }
  func.func @transform_3(%arg0: i32) -> (i32, i32) {
    %c0_i32 = arith.constant 0 : i32
    %c0_i32_0 = arith.constant 0 : i32
    %c0_i32_1 = arith.constant 0 : i32
    return %c0_i32, %c0_i32_0 : i32, i32
  }
  func.func @transform_4(%arg0: i32) -> (i32, i32, i32) {
    %c0_i32 = arith.constant 0 : i32
    %c0_i32_0 = arith.constant 0 : i32
    %c0_i32_1 = arith.constant 0 : i32
    return %arg0, %c0_i32, %c0_i32_0 : i32, i32, i32
  }
}

</mosaic_0001>

<bundles_post_ra>
// kernel: tpu_custom_call.1
= control target key start
LH: loop header
LB: loop body
LE: loop exit
PB: predicated region body
PF: predicated region fallthrough
CT: control target
= control target key end

     0   :  { %9 = vsyncpa [#allocation4], 0  ;;  %s1117_s0 = inlined_call_operand.hbm [shape: f32[2,4,256], index: 0, kind: input, shape index: {}]   ;;  %s1118_s1 = inlined_call_operand.vmem [shape: f32[8,36], index: 1, kind: input, shape index: {}]   ;;  %s1119_s2 = inlined_call_operand.vmem [shape: f32[8,1], index: 2, kind: input, shape index: {}]   ;;  %s1120_s3 = inlined_call_operand.hbm [shape: f32[9,256], index: 3, kind: input, shape index: {}]   ;;  %s1121_s4 = inlined_call_operand.hbm [shape: f32[2,8,256], index: 4, kind: output, shape index: {}]  }
   0x1   :  { %11 = vsyncpa [#allocation4 + $0x1], 0 }
   0x2   :  { %12 = vsyncpa [#allocation7], 0 }
   0x3   :  { %13 = vsyncpa [#allocation5], 0 }
   0x4   :  { %15 = vsyncpa [#allocation5 + $0x1], 0  ;;  %s904_s15 = smov 0   ;;  %s906_s16 = smov 0  }
   0x5   :  { %s908_s17 = smov 0   ;;  %s910_s18 = smov 0  }
   0x6 LB: > { %s925_s19 = sadd.s32 4294967295, %s862_s18   ;;  %s648_s20 = sadd.s32 4294967294, %s862_s18   ;;  %s862_s18 = sphi %s910_s18, %s1143_s18   ;;  %s858_s17 = sphi %s908_s17, %s1142_s17   ;;  %s854_s16 = sphi %s906_s16, %s1141_s16   ;;  %s850_s15 = sphi %s904_s15, %s1140_s15  }
   0x7   : > { %p41_p0 = scmp.ne.s32.totalorder %s854_s16, %s850_s15  ;;  %p1122_p1 = scmp.eq.s32.totalorder %s925_s19, 0 }
   0x8   : > { %p134_p3 = scmp.eq.s32.totalorder %s648_s20, 1  ;;  %p649_p5 = scmp.ge.s32.totalorder %s862_s18, 1 }
   0x9   : > { %p934_p4 = por %p1122_p1, %p41_p0  ;;  %p141_p7 = scmp.lt.s32.totalorder %s862_s18, 3 }
   0xa   : > { %p939_p6 = por %p134_p3, %p41_p0  ;;  %s864_s24 = smov [#allocation6]  }
   0xb   : > { %s1126_s21 = scalar_select %p934_p4, 1, 0 }
   0xc   : > { %s1127_s22 = scalar_select %p939_p6, 1, 0 }
   0xd   : > { %p944_p8 = pnand %p649_p5, %p141_p7  ;;  %s159_s25 = sshll.u32 %s864_s24, 4  ;;  %s160_s25 = int_to_ptr.vmem [resolvable:$true] %s159_s25 }
   0xe   : > { %s958_s27 = sadd.s32 1, %s862_s18   ;;  %s28_s28 = sadd.s32 1, %s858_s17 }
   0xf   : > { %s1128_s23 = scalar_select %p944_p8, 1, 0 }
  0x10   : > { %p677_p9 = pneg %p944_p8  ;;  %s25_s29 = ssub.s32 %s862_s18, %s958_s27 }
  0x11   : > { %s751_s30 = scalar_lea.vmem %s160_s25, 512  ;;  %p759_p5 = scmp.lt.s32.totalorder %s160_s25, %s160_s25 }
  0x12   : > { %p953_p11 = pnand %p677_p9, %p1122_p1  ;;  %p752_p13 = scmp.ne.s32.totalorder %s160_s25, %s751_s30 }
  0x13   : > { %p760_p7 = scmp.lt.s32.totalorder %s751_s30, %s751_s30 }
  0x14   : > { %p742_p12 = pneg %p953_p11 }
  0x15   : > { %p761_p10 = por %p760_p7, %p759_p5 }
  0x16   : > { %p754_p0 = pnand %p752_p13, %p742_p12 }
  0x18   : > { %p755_p3 = pneg %p754_p0 }
  0x1a   : > { %p762_p2 = pnand %p761_p10, %p755_p3 }
  0x1c   : > { %765 = shalt.err (!%p762_p2)
}
  0x1d   : > { %s865_s5 = smov 256   ;;  %s866_s6 = smov 16  }
  0x1e   : > { %680 = dma.hbm_to_vmem [thread:$0]  (!%p953_p11), %s1120_s3, 512, %s160_s25, [#allocation7], %s865_s5, %s865_s5, %s866_s6  }
  0x1f   : > { %p26_p9 = scmp.eq.s32.totalorder %s25_s29, 0  ;;  %p35_p12 = scmp.ne.s32.totalorder %s858_s17, %s854_s16 }
  0x20   : > { %p36_p10 = scmp.eq.s32.totalorder %s862_s18, 0  ;;  %p690_p2 = scmp.lt.s32.totalorder %s862_s18, 2 }
  0x21   : > { %s975_s9 = scalar_select %p26_p9, %s858_s17, %s28_s28  }
  0x22   : > { %p37_p13 = por %p36_p10, %p35_p12  ;;  %p1130_p0 = scmp.eq.s32.totalorder %s925_s19, 1 }
  0x23   : > { %s173_s11 = sand.u32 1, %s858_s17   ;;  %s667_s12 = sshll.u32 %s862_s18, 7 }
  0x24   : > { %p979_p3 = por %p1130_p0, %p35_p12  ;;  %s652_s13 = sshll.u32 %s173_s11, 3 }
  0x25   : > { %s988_s24 = scalar_lea.hbm %s1117_s0, %s667_s12  ;;  %s177_s25 = scalar_lea.vmem [#allocation3], %s652_s13 }
  0x26   : > { %s1131_s10 = scalar_select %p979_p3, 1, 0 }
  0x27   : > { %s185_s26 = sshll.u32 %s177_s25, 4  ;;  %p990_p11 = pnand %p690_p2, %p37_p13  ;;  %s186_s26 = int_to_ptr.vmem [resolvable:$true] %s185_s26 }
  0x28   : > { %s174_s29 = scalar_lea.sflag [#allocation4], %s173_s11  ;;  %s766_s30 = scalar_lea.hbm %s988_s24, 128 }
  0x29   : > { %p767_p5 = scmp.ne.s32.totalorder %s988_s24, %s766_s30  ;;  %p768_p7 = pneg %p990_p11 }
  0x2a   : > { %s771_s7 = scalar_lea.hbm %s1117_s0, 256  ;;  %p772_p10 = scmp.lt.s32.totalorder %s988_s24, %s1117_s0 }
  0x2b   : > { %p769_p9 = pnand %p768_p7, %p767_p5  ;;  %p773_p2 = scmp.lt.s32.totalorder %s771_s7, %s766_s30 }
  0x2d   : > { %p770_p12 = pneg %p769_p9  ;;  %p774_p13 = por %p773_p2, %p772_p10 }
  0x2f   : > { %p775_p0 = pnand %p774_p13, %p770_p12 }
  0x31   : > { %778 = shalt.err (!%p775_p0)
}
  0x32   : > { %s779_s13 = scalar_lea.vmem %s186_s26, 128  ;;  %s867_s11 = smov [#allocation3]  }
  0x33   : > { %p780_p1 = scmp.ne.s32.totalorder %s186_s26, %s779_s13  ;;  %s784_s14 = sshll.u32 %s867_s11, 4  ;;  %s785_s14 = int_to_ptr.vmem [resolvable:$false] %s784_s14 }
  0x34   : > { %s786_s20 = scalar_lea.vmem %s785_s14, 256  ;;  %p787_p5 = scmp.lt.s32.totalorder %s186_s26, %s785_s14 }
  0x35   : > { %p782_p6 = pnand %p780_p1, %p768_p7  ;;  %p788_p9 = scmp.lt.s32.totalorder %s786_s20, %s779_s13 }
  0x37   : > { %p783_p3 = pneg %p782_p6  ;;  %p789_p4 = por %p788_p9, %p787_p5 }
  0x39   : > { %p790_p8 = pnand %p789_p4, %p783_p3 }
  0x3b   : > { %793 = shalt.err (!%p790_p8)
}
  0x3c   : > { %684 = dma.hbm_to_vmem [thread:$0]  (!%p990_p11), %s988_s24, 128, %s186_s26, %s174_s29  }
  0x3d   : > { %p1133_p12 = scmp.ne.s32.totalorder %s1128_s23, 0 }
  0x3e   : > { %s1011_s25 = sand.u32 (!%p1133_p12), 1, %s854_s16   ;;  %p1134_p1 = scmp.ne.s32.totalorder (!%p1133_p12), %s1126_s21, 0 }
  0x3f   : > { %194 = sbr.rel (%p1133_p12) target bundleno = 439 (0x1b7), region = 36  ;;  %s656_s30 = sshll.u32 (!%p1133_p12), %s1011_s25, 3 }
  0x40   : > { %s197_s5 = scalar_lea.sflag (!%p1133_p12), [#allocation4], %s1011_s25  ;;  %s200_s6 = scalar_lea.vmem (!%p1133_p12), [#allocation3], %s656_s30 }
  0x44   : > { %837 = dma.done.wait (%p1134_p1), %s197_s5, 128  }
  0x45   : > { %839 = vsyncadd (%p1134_p1), %s197_s5, 4294967168  ;;  %p1135_p4 = scmp.eq.s32.totalorder %s925_s19, 0 }
  0x47   : > { %841 = dma.done.wait (%p1135_p4), [#allocation7], 512   ;;  %p1136_p6 = pmov %p1135_p4 }
  0x48   : > { %v229_v0 = vld [vmem:[%s200_s6] sm:$0xff]  ;;  %s868_s23 = smov 111   ;;  %s869_s24 = smov 112   ;;  %v875_v2 = vmov 0.0   ;;  %v877_v3 = vmov 0   ;;  %v463_v4 = vld [vmem:[%s1119_s2] sm:$0xff]  ;;  %v237_v5 = vlaneseq }
  0x49   : > { %843 = vsyncadd (%p1136_p6), [#allocation7], 4294966784  ;;  %428 = vrot.lane.b32.xlu1 %v229_v0, %s868_s23  ;;  %342 = vst [vmem:[#allocation2 + $0x48] sm:$0xf] %v229_v0  ;;  %398 = vrot.lane.b32.xlu0 %v229_v0, %s869_s24  ;;  %v231_v1 = vcombine.high %v229_v0, %v229_v0  ;;  %s870_s26 = smov 127   ;;  %s871_s21 = smov 113  }
  0x4a   : > { %s872_s28 = smov 1   ;;  %s873_s29 = smov 16   ;;  %544 = vmatprep.mubr.f32.mxu0 %v875_v2  ;;  %738 = vset.pattern.permute.xlu0 %v877_v3  ;;  %v245_v6 = vshrl.u32 %v237_v5, 7  ;;  %v1026_v7 = vand.u32 127, %v237_v5  ;;  %vm473_vm4 = vcmask 1043456   ;;  %vm469_vm9 = vcmask 293888  }
  0x4b   : > { %343 = vst [vmem:[#allocation2 + $0x28] sm:$0xf] %v231_v1  ;;  %s874_s7 = smov 15   ;;  %s876_s8 = smov 17  }
  0x4c   : > { %v1028_v8 = vsub.s32 0, %v245_v6  ;;  %v1030_v9 = vsub.s32 1, %v245_v6  ;;  %v436_v10 = vld [vmem:[#allocation6 + $0x10] ss:$8 sm:$0x3]  ;;  %vm432_vm0 = vcmp.lt.s32.totalorder %v1026_v7, 111 }
  0x4d   : > { %344 = vrot.lane.b32.xlu0 %v229_v0, %s870_s26  ;;  %430 = vrot.lane.b32.xlu1 %v231_v1, %s868_s23  ;;  %v352_v15 = vld [vmem:[#allocation6 + $0x5] ss:$8 sm:$0x3]  ;;  %v406_v16 = vld [vmem:[#allocation6 + $0x7] ss:$8 sm:$0x3] }
  0x4e   : > { %v441_v13 = vrot.slane %v436_v10, %v1028_v8  ;;  %v445_v14 = vrot.slane %v436_v10, %v1030_v9  ;;  %vm348_vm1 = vcmp.lt.s32.totalorder %v1026_v7, 127  ;;  %vm402_vm2 = vcmp.lt.s32.totalorder %v1026_v7, 112  ;;  %v382_v23 = vld [vmem:[#allocation6 + $0x6] ss:$8 sm:$0x3]  ;;  %s658_s20 = sshll.u32 %s1011_s25, 4 }
  0x4f   : > { %v357_v21 = vrot.slane %v352_v15, %v1028_v8  ;;  %v361_v22 = vrot.slane %v352_v15, %v1030_v9  ;;  %v411_v26 = vrot.slane %v406_v16, %v1028_v8  ;;  %v415_v27 = vrot.slane %v406_v16, %v1030_v9  ;;  %v320_v40 = vld [vmem:[#allocation6 + $0x3] ss:$8 sm:$0x3]  ;;  %v266_v53 = vld [vmem:[#allocation6 + $0x1] ss:$8 sm:$0x3] }
  0x50   : > { %vm378_vm3 = vcmp.lt.s32.totalorder %v1026_v7, 113  ;;  %v387_v30 = vrot.slane %v382_v23, %v1028_v8  ;;  %v391_v31 = vrot.slane %v382_v23, %v1030_v9  ;;  %vm316_vm5 = vcmp.lt.s32.totalorder %v1026_v7, 1  ;;  %v242_v16 = vld [vmem:[#allocation6] ss:$8 sm:$0x3]  ;;  %s668_s30 = sshll.u32 %s925_s19, 8 }
  0x51   : > { %346 = vrot.lane.b32.xlu1 %v231_v1, %s870_s26  ;;  %400 = vrot.lane.b32.xlu0 %v231_v1, %s869_s24  ;;  %v325_v51 = vrot.slane %v320_v40, %v1028_v8  ;;  %v329_v52 = vrot.slane %v320_v40, %v1030_v9  ;;  %vm262_vm6 = vcmp.lt.s32.totalorder %v1026_v7, 16  ;;  %v271_v62 = vrot.slane %v266_v53, %v1028_v8  ;;  %s228_s5 = scalar_lea.vmem [#allocation8], %s658_s20  ;;  %s566_s26 = scalar_lea.hbm %s1121_s4, %s668_s30 }
  0x52   : > { %v275_v63 = vrot.slane %v266_v53, %v1030_v9  ;;  %vm292_vm7 = vcmp.lt.s32.totalorder %v1026_v7, 15  ;;  %vm239_vm8 = vcmp.lt.s32.totalorder %v1026_v7, 17  ;;  %s568_s6 = sshll.u32 %s228_s5, 4  ;;  %p1137_p3 = scmp.ne.s32.totalorder %s1131_s10, 0  ;;  %s569_s6 = int_to_ptr.vmem [resolvable:$true] %s568_s6 }
  0x55   : > { %376 = vrot.lane.b32.xlu1 %v231_v1, %s871_s21  ;;  %374 = vrot.lane.b32.xlu0 %v229_v0, %s871_s21  ;;  %s554_s21 = scalar_lea.sflag [#allocation5], %s1011_s25 }
  0x59   : > { %314 = vrot.lane.b32.xlu1 %v231_v1, %s872_s28  ;;  %312 = vrot.lane.b32.xlu0 %v229_v0, %s872_s28  ;;  %s794_s28 = scalar_lea.vmem %s569_s6, 256 }
  0x5a   : > { %p795_p8 = scmp.ne.s32.totalorder %s569_s6, %s794_s28 }
  0x5c   : > { %p796_p11 = pnand %p795_p8, %p1137_p3 }
  0x5d   : > { %260 = vrot.lane.b32.xlu1 %v231_v1, %s873_s29  ;;  %258 = vrot.lane.b32.xlu0 %v229_v0, %s873_s29  ;;  %s878_s29 = smov [#allocation8]  }
  0x5e   : > { %p797_p7 = pneg %p796_p11  ;;  %s798_s19 = sshll.u32 %s878_s29, 4  ;;  %s799_s19 = int_to_ptr.vmem [resolvable:$false] %s798_s19 }
  0x5f   : > { %p801_p10 = scmp.lt.s32.totalorder %s569_s6, %s799_s19 }
  0x61   : > { %290 = vrot.lane.b32.xlu1 %v231_v1, %s874_s7  ;;  %288 = vrot.lane.b32.xlu0 %v229_v0, %s874_s7  ;;  %s800_s7 = scalar_lea.vmem %s799_s19, 512 }
  0x62   : > { %p802_p2 = scmp.lt.s32.totalorder %s800_s7, %s794_s28 }
  0x64   : > { %p803_p13 = por %p802_p2, %p801_p10 }
  0x65   : > { %235 = vrot.lane.b32.xlu1 %v231_v1, %s876_s8  ;;  %233 = vrot.lane.b32.xlu0 %v229_v0, %s876_s8  ;;  %v296_v0 = vld [vmem:[#allocation6 + $0x2] ss:$8 sm:$0x3] }
  0x66   : > { %p804_p0 = pnand %p803_p13, %p797_p7 }
  0x69   : > { %466 = vperm.xlu0 %738, %v463_v4  }
  0xbb   : > { %v429_v11 = vpop.permute.xlu1 %428  ;;  %v399_v12 = vpop.permute.xlu0 %398 }
  0xbf   : > { %v345_v17 = vpop.permute.xlu0 %344  ;;  %v431_v18 = vpop.permute.xlu1 %430 }
  0xc0   : > { %v433_v19 = vsel %vm432_vm0, %v429_v11, %v431_v18  ;;  %v434_v20 = vsel %vm432_vm0, %v431_v18, %v429_v11 }
  0xc1   : > { %v448_v24 = vmul.f32 %v441_v13, %v433_v19  ;;  %v449_v25 = vmul.f32 %v445_v14, %v434_v20  ;;  %v305_v13 = vrot.slane %v296_v0, %v1030_v9 }
  0xc3   : > { %450 = vst [vmem:[#allocation2 + $0x40] sm:$0xf] %v448_v24  ;;  %451 = vst [vmem:[#allocation2 + $0x38] sm:$0xf] %v449_v25  ;;  %v347_v28 = vpop.permute.xlu1 %346  ;;  %v401_v29 = vpop.permute.xlu0 %400 }
  0xc4   : > { %v349_v32 = vsel %vm348_vm1, %v345_v17, %v347_v28  ;;  %v350_v33 = vsel %vm348_vm1, %v347_v28, %v345_v17  ;;  %v403_v34 = vsel %vm402_vm2, %v399_v12, %v401_v29  ;;  %v404_v35 = vsel %vm402_vm2, %v401_v29, %v399_v12 }
  0xc5   : > { %v364_v36 = vmul.f32 %v357_v21, %v349_v32  ;;  %v365_v37 = vmul.f32 %v361_v22, %v350_v33  ;;  %v418_v38 = vmul.f32 %v411_v26, %v403_v34  ;;  %v419_v39 = vmul.f32 %v415_v27, %v404_v35 }
  0xc6   : > { %v301_v12 = vrot.slane %v296_v0, %v1028_v8  ;;  %v247_v27 = vrot.slane %v242_v16, %v1028_v8  ;;  %v251_v28 = vrot.slane %v242_v16, %v1030_v9  ;;  %v452_v9 = vld [vmem:[%s1118_s1] sm:$0xff] }
  0xc7   : > { %v368_v41 = vrot.slane %v364_v36, 4  ;;  %v369_v42 = vrot.slane %v365_v37, 4  ;;  %v422_v43 = vrot.slane %v418_v38, 4  ;;  %v423_v44 = vrot.slane %v419_v39, 4  ;;  %v377_v45 = vpop.permute.xlu1 %376  ;;  %v375_v46 = vpop.permute.xlu0 %374 }
  0xc8   : > { %v379_v47 = vsel %vm378_vm3, %v375_v46, %v377_v45  ;;  %v380_v48 = vsel %vm378_vm3, %v377_v45, %v375_v46 }
  0xc9   : > { %372 = vst [vmem:[#allocation2 + $0x48] sm:$0xf0] %v368_v41  ;;  %373 = vst [vmem:[#allocation2 + $0x28] sm:$0xf0] %v369_v42  ;;  %v394_v49 = vmul.f32 %v387_v30, %v379_v47  ;;  %v395_v50 = vmul.f32 %v391_v31, %v380_v48 }
  0xca   : > { %426 = vst [vmem:[#allocation2 + $0x8] sm:$0xf0] %v422_v43  ;;  %427 = vst [vmem:[#allocation2 + $0x20] sm:$0xf0] %v423_v44  ;;  %v462_v54 = vld [vmem:[#allocation2 + $0x38] sm:$0xf] }
  0xcb   : > { %v461_v55 = vld [vmem:[#allocation2 + $0x40] sm:$0xf]  ;;  %396 = vst [vmem:[#allocation2 + $0x8] sm:$0xf] %v394_v49  ;;  %397 = vst [vmem:[#allocation2 + $0x20] sm:$0xf] %v395_v50  ;;  %659 = vmatprep.subr.msk.mxu0 %vm473_vm4, %v462_v54  ;;  %v315_v56 = vpop.permute.xlu1 %314  ;;  %v313_v57 = vpop.permute.xlu0 %312 }
  0xcc   : > { %v317_v58 = vsel %vm316_vm5, %v313_v57, %v315_v56  ;;  %v318_v59 = vsel %vm316_vm5, %v315_v56, %v313_v57  ;;  %660 = vmatpush1.msk.msra.mxu0 %vm473_vm4, %v461_v55 }
  0xcd   : > { %v332_v60 = vmul.f32 %v325_v51, %v318_v59  ;;  %v333_v61 = vmul.f32 %v329_v52, %v317_v58 }
  0xcf   : > { %v336_v1 = vrot.slane %v332_v60, 4  ;;  %v337_v2 = vrot.slane %v333_v61, 4  ;;  %v261_v3 = vpop.permute.xlu1 %260  ;;  %v259_v4 = vpop.permute.xlu0 %258 }
  0xd0   : > { %v263_v5 = vsel %vm262_vm6, %v259_v4, %v261_v3  ;;  %v264_v6 = vsel %vm262_vm6, %v261_v3, %v259_v4  ;;  %v458_v23 = vld [vmem:[#allocation2 + $0x28] sm:$0xff] }
  0xd1   : > { %340 = vst [vmem:[#allocation2 + $0x18] sm:$0xf0] %v336_v1  ;;  %341 = vst [vmem:[#allocation2 + $0x10] sm:$0xf0] %v337_v2  ;;  %v278_v10 = vmul.f32 %v271_v62, %v264_v6  ;;  %v279_v11 = vmul.f32 %v275_v63, %v263_v5  ;;  %v457_v26 = vld [vmem:[#allocation2 + $0x48] sm:$0xff] }
  0xd2   : > { %v460_v14 = vld [vmem:[#allocation2 + $0x20] sm:$0xff]  ;;  %v459_v15 = vld [vmem:[#allocation2 + $0x8] sm:$0xff] }
  0xd3   : > { %v282_v17 = vrot.slane %v278_v10, 4  ;;  %v283_v18 = vrot.slane %v279_v11, 4  ;;  %v291_v19 = vpop.permute.xlu1 %290  ;;  %504 = vmatprep.subr.mxu0 %v460_v14  ;;  %v289_v20 = vpop.permute.xlu0 %288 }
  0xd4   : > { %v293_v21 = vsel %vm292_vm7, %v289_v20, %v291_v19  ;;  %v294_v22 = vsel %vm292_vm7, %v291_v19, %v289_v20  ;;  %505 = vmatpush1.msra.mxu0 %v459_v15 }
  0xd5   : > { %286 = vst [vmem:[#allocation2 + $0x30] sm:$0xf0] %v282_v17  ;;  %287 = vst [vmem:[#allocation2] sm:$0xf0] %v283_v18  ;;  %v308_v24 = vmul.f32 %v301_v12, %v294_v22  ;;  %v309_v25 = vmul.f32 %v305_v13, %v293_v21  ;;  %506 = vmatprep.subr.mxu0 %v458_v23 }
  0xd6   : > { %507 = vmatpush1.msra.mxu0 %v457_v26 }
  0xd7   : > { %310 = vst [vmem:[#allocation2 + $0x18] sm:$0xf] %v308_v24  ;;  %311 = vst [vmem:[#allocation2 + $0x10] sm:$0xf] %v309_v25  ;;  %v236_v29 = vpop.permute.xlu1 %235  ;;  %v234_v30 = vpop.permute.xlu0 %233 }
  0xd8   : > { %v240_v31 = vsel %vm239_vm8, %v234_v30, %v236_v29  ;;  %v241_v32 = vsel %vm239_vm8, %v236_v29, %v234_v30 }
  0xd9   : > { %v254_v33 = vmul.f32 %v247_v27, %v241_v32  ;;  %v255_v7 = vmul.f32 %v251_v28, %v240_v31 }
  0xdb   : > { %256 = vst [vmem:[#allocation2 + $0x30] sm:$0xf] %v254_v33  ;;  %257 = vst [vmem:[#allocation2] sm:$0xf] %v255_v7 }
  0xde   : > { %v456_v34 = vld [vmem:[#allocation2 + $0x10] sm:$0xff]  ;;  %v455_v35 = vld [vmem:[#allocation2 + $0x18] sm:$0xff] }
  0xdf   : > { %508 = vmatprep.subr.mxu0 %v456_v34 }
  0xe0   : > { %509 = vmatpush1.msra.mxu0 %v455_v35 }
  0xe2   : > { %v454_v8 = vld [vmem:[#allocation2] sm:$0xff]  ;;  %v453_v36 = vld [vmem:[#allocation2 + $0x30] sm:$0xff] }
  0xe3   : > { %510 = vmatprep.subr.mxu0 %v454_v8 }
  0xe4   : > { %511 = vmatpush1.msra.mxu0 %v453_v36  ;;  %v467_v37 = vpop.permute.xlu0 %466 }
  0xe5   : > { %661 = vmatmul.mubr.msk.f32.vlgmr.msra.gmra.mxu0 %vm469_vm9, %v452_v9 }
 0x1a5   : > { %v546_v38 = vpop.f32.mrf.mxu0 }
 0x1a6   : > { %v547_v39 = vadd.f32 %v546_v38, %v467_v37 }
 0x1a7   : > { %v548_v40 = vpop.f32.mrf.mxu0 }
 0x1a8   : > { %551 = vst [vmem:[%s228_s5] sm:$0xff] %v547_v39  ;;  %v549_v41 = vadd.f32 %v548_v40, %v467_v37 }
 0x1aa   : > { %552 = vst [vmem:[%s228_s5 + $0x8] sm:$0xff] %v549_v41 }
 0x1ab   : > { %807 = shalt.err (!%p804_p0)
}
 0x1ac   : > { %s808_s8 = scalar_lea.hbm %s566_s26, 256  ;;  %s812_s13 = scalar_lea.hbm %s1121_s4, 512 }
 0x1ad   : > { %p809_p5 = scmp.ne.s32.totalorder %s566_s26, %s808_s8  ;;  %p813_p1 = scmp.lt.s32.totalorder %s566_s26, %s1121_s4 }
 0x1ae   : > { %p814_p4 = scmp.lt.s32.totalorder %s812_s13, %s808_s8 }
 0x1af   : > { %p810_p9 = pnand %p809_p5, %p1137_p3 }
 0x1b0   : > { %p815_p6 = por %p814_p4, %p813_p1 }
 0x1b1   : > { %p811_p12 = pneg %p810_p9 }
 0x1b3   : > { %p816_p8 = pnand %p815_p6, %p811_p12 }
 0x1b5   : > { %819 = shalt.err (!%p816_p8)
}
 0x1b6   : > { %675 = dma.vmem_to_hbm [thread:$0]  (%p1137_p3), %s569_s6, 256, %s566_s26, %s554_s21  }
 0x1b7 PF: > { %s580_s20 = sand.u32 1, %s850_s15   ;;  %p1138_p11 = scmp.ne.s32.totalorder %s1127_s22, 0 }
 0x1b8   : > { %p1139_p7 = scmp.ge.s32.totalorder %s862_s18, 2  ;;  %s581_s30 = scalar_lea.sflag [#allocation5], %s580_s20 }
 0x1ba   : > { %p686_p10 = pnand %p1139_p7, %p1138_p11 }
 0x1bc   : > { %p687_p2 = pneg %p686_p10 }
 0x1be   : > { %845 = dma.done.wait (%p687_p2), %s581_s30, 256  }
 0x1bf   : > { %847 = vsyncadd (%p687_p2), %s581_s30, 4294967040  ;;  %p18_p13 = scmp.ge.s32.totalorder %s958_s27, 4   ;;  %s1140_s15 = smov %s854_s16 }
 0x1c0   : > { %s1141_s16 = smov %s858_s17  ;;  %s1142_s17 = smov %s975_s9 }
 0x1c1   : > { %s1143_s18 = smov %s958_s27  ;;  %20 = sbr.rel (!%p18_p13) target bundleno = 6 (0x6), region = 92 }
 0x1c6   :  { %586 = vsyncpa [#allocation4], 1 }
 0x1c7   :  { %588 = vsyncpa [#allocation4 + $0x1], 1 }
 0x1c8   :  { %589 = vsyncpa [#allocation7], 1 }
 0x1c9   :  { %590 = vsyncpa [#allocation5], 1 }
 0x1ca   :  { %592 = vsyncpa [#allocation5 + $0x1], 1 }

</bundles_post_ra>
